<compile_context>
chip_gen: v7x
topology: tpu7x:2x2x1
jax: 0.10.0
libtpu: 0.0.40
codegen_flags: <defaults>
</compile_context>

<pallas_src>
import functools
import math

import jax
import jax.numpy as jnp
from jax.experimental import pallas as pl
from jax.experimental.pallas import tpu as pltpu


# ---------------------------------------------------------------------------
# Fused encoder kernel: grid = (T,), one grid step == one RNN time step.
# ---------------------------------------------------------------------------

def _make_encoder_kernel(num_layers, hidden):
    def kernel(*refs):
        # refs layout:
        #   embs_ref  : (1, B, E)  f32   current time-step embeddings
        #   len_ref   : (B, 1)     i32   sequence lengths
        #   per layer : w_ih_t (in,3H) bf16, w_hh_t (H,3H) bf16,
        #               b_ih (1,3H) f32,  b_hh (1,3H) f32
        #   out_ref   : (1, B, H)  f32   output row for this time step
        #   state_ref : (L, B, H)  f32   resident accumulator == hidden state
        embs_ref = refs[0]
        len_ref = refs[1]
        w_refs = refs[2:2 + 4 * num_layers]
        out_ref = refs[2 + 4 * num_layers]
        state_ref = refs[3 + 4 * num_layers]

        t = pl.program_id(0)
        H = hidden

        # nn.GRU default initial hidden state is zero.
        @pl.when(t == 0)
        def _():
            state_ref[...] = jnp.zeros_like(state_ref)

        # Packed-sequence mask: rows with t >= length are frozen / zero-padded.
        mask = t < len_ref[...]          # (B, 1) bool
        x = embs_ref[0]                  # (B, E) f32

        for l in range(num_layers):
            w_ih = w_refs[4 * l + 0][...]        # (in, 3H) bf16
            w_hh = w_refs[4 * l + 1][...]        # (H, 3H)  bf16
            b_ih = w_refs[4 * l + 2][...]        # (1, 3H)  f32
            b_hh = w_refs[4 * l + 3][...]        # (1, 3H)  f32
            h_prev = state_ref[l]                # (B, H)   f32

            # bf16 x bf16 -> f32 on the MXU; gate math stays f32 on the VPU/EUP.
            gi = jnp.dot(x.astype(jnp.bfloat16), w_ih,
                         preferred_element_type=jnp.float32) + b_ih
            gh = jnp.dot(h_prev.astype(jnp.bfloat16), w_hh,
                         preferred_element_type=jnp.float32) + b_hh

            # PyTorch GRU gate order: [r | z | n]; H is a multiple of 128 so
            # these slices are lane-aligned.
            r = jax.nn.sigmoid(gi[:, 0:H] + gh[:, 0:H])
            z = jax.nn.sigmoid(gi[:, H:2 * H] + gh[:, H:2 * H])
            n = jnp.tanh(gi[:, 2 * H:3 * H] + r * gh[:, 2 * H:3 * H])
            h_new = (1.0 - z) * n + z * h_prev

            # pack() semantics: finished sequences keep their last hidden.
            h_new = jnp.where(mask, h_new, h_prev)
            state_ref[l] = h_new
            x = h_new  # inter-layer dropout is identity in eval mode

        # pad_packed_sequence() semantics: pad positions are zero.
        out_ref[0] = jnp.where(mask, x, 0.0)

    return kernel


# ---------------------------------------------------------------------------
# Parameter construction (mirrors PyTorch shapes; weights stored transposed
# as (in_features, out_features) so every matmul is a plain x @ W).
# ---------------------------------------------------------------------------

def init_params(key, *, vocab, emb, hidden, num_layers, padding_idx=0):
    params = {}
    key, k = jax.random.split(key)
    embw = 0.1 * jax.random.normal(k, (vocab, emb), dtype=jnp.float32)
    embw = embw.at[padding_idx].set(0.0)
    params["embedding"] = embw

    cells = []
    in_size = emb
    for _ in range(num_layers):
        bound = 1.0 / math.sqrt(hidden)
        key, k1, k2, k3, k4 = jax.random.split(key, 5)
        w_ih_t = jax.random.uniform(k1, (in_size, 3 * hidden), jnp.float32,
                                    -bound, bound).astype(jnp.bfloat16)
        w_hh_t = jax.random.uniform(k2, (hidden, 3 * hidden), jnp.float32,
                                    -bound, bound).astype(jnp.bfloat16)
        b_ih = jax.random.uniform(k3, (1, 3 * hidden), jnp.float32, -bound, bound)
        b_hh = jax.random.uniform(k4, (1, 3 * hidden), jnp.float32, -bound, bound)
        cells.append((w_ih_t, w_hh_t, b_ih, b_hh))
        in_size = hidden
    params["gru"] = cells
    return params


# ---------------------------------------------------------------------------
# Forward pass: one XLA gather for the embeddings, then one fused pallas_call.
# ---------------------------------------------------------------------------

def rnn_encoder_forward(params, token_ids, lengths, *, dec_num_layers):
    """token_ids: (T, B) int32, lengths: (B,) int32 (descending, max == T).

    Returns (outputs (T, B, H) f32, state (dec_num_layers, B, H) f32).
    """
    T, B = token_ids.shape
    emb_tbl = params["embedding"]
    E = emb_tbl.shape[1]
    H = params["gru"][0][1].shape[0]       # w_hh_t: (H, 3H)
    L = len(params["gru"])

    # Embedding lookup (emb_dropout is identity in eval mode).
    embs = jnp.take(emb_tbl, token_ids.reshape(-1), axis=0).reshape(T, B, E)
    len_col = lengths.reshape(B, 1).astype(jnp.int32)

    weight_args = []
    weight_specs = []
    for (w_ih_t, w_hh_t, b_ih, b_hh) in params["gru"]:
        for w in (w_ih_t, w_hh_t, b_ih, b_hh):
            weight_args.append(w)
            # Constant block index -> weight stays resident in VMEM across T.
            weight_specs.append(pl.BlockSpec(w.shape, lambda t: (0, 0)))

    kernel = _make_encoder_kernel(L, H)

    outputs, state = pl.pallas_call(
        kernel,
        grid=(T,),
        in_specs=[
            pl.BlockSpec((1, B, E), lambda t: (t, 0, 0)),   # embeddings, per step
            pl.BlockSpec((B, 1), lambda t: (0, 0)),         # lengths, resident
            *weight_specs,
        ],
        out_specs=[
            pl.BlockSpec((1, B, H), lambda t: (t, 0, 0)),   # outputs row
            pl.BlockSpec((L, B, H), lambda t: (0, 0, 0)),   # hidden-state accumulator
        ],
        out_shape=[
            jax.ShapeDtypeStruct((T, B, H), jnp.float32),
            jax.ShapeDtypeStruct((L, B, H), jnp.float32),
        ],
        compiler_params=pltpu.CompilerParams(
            dimension_semantics=("arbitrary",)),            # recurrence over time
    )(embs, len_col, *weight_args)

    # GRU branch of the module: state = state[:config.dec_num_layers]
    state = state[:dec_num_layers]
    return outputs, state


# ---------------------------------------------------------------------------
# Main
# ---------------------------------------------------------------------------

if __name__ == "__main__":
    VOCAB = 64
    EMB = 128           # multiple of 128 lanes
    HIDDEN = 128        # multiple of 128 lanes -> lane-aligned gate slices
    ENC_NUM_LAYERS = 2
    DEC_NUM_LAYERS = 2
    SEQ = 8
    BATCH = 8           # full 8-sublane occupancy (f32)

    key = jax.random.PRNGKey(0)
    key, kp, ki = jax.random.split(key, 3)

    params = init_params(kp, vocab=VOCAB, emb=EMB, hidden=HIDDEN,
                         num_layers=ENC_NUM_LAYERS, padding_idx=0)

    # (seq, batch) token ids; lengths descending (as pack() requires), with at
    # least one full-length sequence so unpack() returns SEQ rows.
    token_ids = jax.random.randint(ki, (SEQ, BATCH), 1, VOCAB, dtype=jnp.int32)
    lengths = jnp.array([8, 8, 7, 6, 5, 4, 3, 2], dtype=jnp.int32)
    time_idx = jnp.arange(SEQ, dtype=jnp.int32)[:, None]
    token_ids = jnp.where(time_idx < lengths[None, :], token_ids, 0)  # pad tokens

    fwd = jax.jit(functools.partial(rnn_encoder_forward,
                                    dec_num_layers=DEC_NUM_LAYERS))
    outputs, state = fwd(params, token_ids, lengths)
    jax.block_until_ready((outputs, state))

    assert outputs.shape == (SEQ, BATCH, HIDDEN)
    assert state.shape == (DEC_NUM_LAYERS, BATCH, HIDDEN)
    assert bool(jnp.all(jnp.isfinite(outputs)))
    assert bool(jnp.all(jnp.isfinite(state)))
    # pad_packed_sequence semantics: positions beyond each length are zero.
    pad_mask = (time_idx >= lengths[None, :])[..., None]
    assert bool(jnp.all(jnp.where(pad_mask, outputs, 0.0) == 0.0))
    print("KERNEL_OK")
</pallas_src>

<mosaic_0001>
module attributes {stable_mosaic.version = 11 : i64} {
  func.func @kernel(%arg0: i32, %arg1: memref<1x8x128xf32, #tpu.memory_space<vmem>>, %arg2: memref<8x1xi32, #tpu.memory_space<vmem>>, %arg3: memref<128x384xbf16, #tpu.memory_space<vmem>>, %arg4: memref<128x384xbf16, #tpu.memory_space<vmem>>, %arg5: memref<1x384xf32, #tpu.memory_space<vmem>>, %arg6: memref<1x384xf32, #tpu.memory_space<vmem>>, %arg7: memref<128x384xbf16, #tpu.memory_space<vmem>>, %arg8: memref<128x384xbf16, #tpu.memory_space<vmem>>, %arg9: memref<1x384xf32, #tpu.memory_space<vmem>>, %arg10: memref<1x384xf32, #tpu.memory_space<vmem>>, %arg11: memref<1x8x128xf32, #tpu.memory_space<vmem>>, %arg12: memref<2x8x128xf32, #tpu.memory_space<vmem>>) attributes {dimension_semantics = [#tpu.dimension_semantics<arbitrary>], iteration_bounds = array<i64: 8>, scalar_prefetch = 0 : i64, scratch_operands = 0 : i64, tpu.core_type = #tpu.core_type<tc>, window_params = [{transform_indices = @transform_0, window_bounds = array<i64: 1, 8, 128>}, {pipeline_mode = #tpu.pipeline_mode<synchronous>, transform_indices = @transform_1, window_bounds = array<i64: 8, 1>}, {pipeline_mode = #tpu.pipeline_mode<synchronous>, transform_indices = @transform_2, window_bounds = array<i64: 128, 384>}, {pipeline_mode = #tpu.pipeline_mode<synchronous>, transform_indices = @transform_3, window_bounds = array<i64: 128, 384>}, {pipeline_mode = #tpu.pipeline_mode<synchronous>, transform_indices = @transform_4, window_bounds = array<i64: 1, 384>}, {pipeline_mode = #tpu.pipeline_mode<synchronous>, transform_indices = @transform_5, window_bounds = array<i64: 1, 384>}, {pipeline_mode = #tpu.pipeline_mode<synchronous>, transform_indices = @transform_6, window_bounds = array<i64: 128, 384>}, {pipeline_mode = #tpu.pipeline_mode<synchronous>, transform_indices = @transform_7, window_bounds = array<i64: 128, 384>}, {pipeline_mode = #tpu.pipeline_mode<synchronous>, transform_indices = @transform_8, window_bounds = array<i64: 1, 384>}, {pipeline_mode = #tpu.pipeline_mode<synchronous>, transform_indices = @transform_9, window_bounds = array<i64: 1, 384>}, {transform_indices = @transform_10, window_bounds = array<i64: 1, 8, 128>}, {pipeline_mode = #tpu.pipeline_mode<synchronous>, transform_indices = @transform_11, window_bounds = array<i64: 2, 8, 128>}]} {
    %c0_i32 = arith.constant 0 : i32
    %0 = arith.cmpi eq, %arg0, %c0_i32 : i32
    %1 = arith.extui %0 : i1 to i32
    %c0_i32_0 = arith.constant 0 : i32
    %2 = arith.cmpi ne, %1, %c0_i32_0 : i32
    scf.if %2 {
      %cst_45 = arith.constant 0.000000e+00 : f32
      %107 = vector.broadcast %cst_45 : f32 to vector<2x8x128xf32>
      %c0_46 = arith.constant 0 : index
      %c0_47 = arith.constant 0 : index
      %c0_48 = arith.constant 0 : index
      %108 = vector.load %arg12[%c0_46, %c0_47, %c0_48] : memref<2x8x128xf32, #tpu.memory_space<vmem>>, vector<2x8x128xf32>
      tpu.vector_store %arg12[%c0_46, %c0_47, %c0_48], %107 {strides = array<i32>} : memref<2x8x128xf32, #tpu.memory_space<vmem>>, vector<2x8x128xf32>,
    } else {
    }
    %c0 = arith.constant 0 : index
    %c0_1 = arith.constant 0 : index
    %3 = vector.load %arg2[%c0, %c0_1] : memref<8x1xi32, #tpu.memory_space<vmem>>, vector<8x1xi32>
    %4 = vector.broadcast %arg0 : i32 to vector<8x1xi32>
    %5 = arith.cmpi slt, %4, %3 : vector<8x1xi32>
    %c0_2 = arith.constant 0 : index
    %c0_3 = arith.constant 0 : index
    %c0_4 = arith.constant 0 : index
    %6 = vector.load %arg1[%c0_2, %c0_3, %c0_4] : memref<1x8x128xf32, #tpu.memory_space<vmem>>, vector<1x8x128xf32>
    %7 = vector.shape_cast %6 : vector<1x8x128xf32> to vector<8x128xf32>
    %c0_5 = arith.constant 0 : index
    %c0_6 = arith.constant 0 : index
    %8 = vector.load %arg3[%c0_5, %c0_6] : memref<128x384xbf16, #tpu.memory_space<vmem>>, vector<128x384xbf16>
    %c0_7 = arith.constant 0 : index
    %c0_8 = arith.constant 0 : index
    %9 = vector.load %arg4[%c0_7, %c0_8] : memref<128x384xbf16, #tpu.memory_space<vmem>>, vector<128x384xbf16>
    %c0_9 = arith.constant 0 : index
    %c0_10 = arith.constant 0 : index
    %10 = vector.load %arg5[%c0_9, %c0_10] : memref<1x384xf32, #tpu.memory_space<vmem>>, vector<1x384xf32>
    %c0_11 = arith.constant 0 : index
    %c0_12 = arith.constant 0 : index
    %11 = vector.load %arg6[%c0_11, %c0_12] : memref<1x384xf32, #tpu.memory_space<vmem>>, vector<1x384xf32>
    %c0_13 = arith.constant 0 : index
    %c0_14 = arith.constant 0 : index
    %c0_15 = arith.constant 0 : index
    %12 = vector.load %arg12[%c0_13, %c0_14, %c0_15] : memref<2x8x128xf32, #tpu.memory_space<vmem>>, vector<1x8x128xf32>
    %13 = vector.shape_cast %12 : vector<1x8x128xf32> to vector<8x128xf32>
    %14 = arith.truncf %7 : vector<8x128xf32> to vector<8x128xbf16>
    %cst = arith.constant dense<0.000000e+00> : vector<8x384xf32>
    %15 = tpu.matmul %14, %8, %cst {dimension_numbers = #tpu.dot_dimension_numbers<[1], [0], [0], [1], [0, 0, 1, 1], [], []>} : vector<8x128xbf16>, vector<128x384xbf16>, vector<8x384xf32> -> vector<8x384xf32>
    %16 = vector.broadcast %10 : vector<1x384xf32> to vector<8x384xf32>
    %17 = arith.addf %15, %16 : vector<8x384xf32>
    %18 = arith.truncf %13 : vector<8x128xf32> to vector<8x128xbf16>
    %cst_16 = arith.constant dense<0.000000e+00> : vector<8x384xf32>
    %19 = tpu.matmul %18, %9, %cst_16 {dimension_numbers = #tpu.dot_dimension_numbers<[1], [0], [0], [1], [0, 0, 1, 1], [], []>} : vector<8x128xbf16>, vector<128x384xbf16>, vector<8x384xf32> -> vector<8x384xf32>
    %20 = vector.broadcast %11 : vector<1x384xf32> to vector<8x384xf32>
    %21 = arith.addf %19, %20 : vector<8x384xf32>
    %22 = vector.extract_strided_slice %17 {offsets = [0, 0], sizes = [8, 128], strides = [1, 1]} : vector<8x384xf32> to vector<8x128xf32>
    %23 = vector.extract_strided_slice %21 {offsets = [0, 0], sizes = [8, 128], strides = [1, 1]} : vector<8x384xf32> to vector<8x128xf32>
    %24 = arith.addf %22, %23 : vector<8x128xf32>
    %25 = arith.negf %24 : vector<8x128xf32>
    %26 = math.exp %25 : vector<8x128xf32>
    %cst_17 = arith.constant 1.000000e+00 : f32
    %27 = vector.broadcast %cst_17 : f32 to vector<8x128xf32>
    %28 = arith.addf %27, %26 : vector<8x128xf32>
    %29 = arith.divf %27, %28 : vector<8x128xf32>
    %30 = vector.extract_strided_slice %17 {offsets = [0, 128], sizes = [8, 128], strides = [1, 1]} : vector<8x384xf32> to vector<8x128xf32>
    %31 = vector.extract_strided_slice %21 {offsets = [0, 128], sizes = [8, 128], strides = [1, 1]} : vector<8x384xf32> to vector<8x128xf32>
    %32 = arith.addf %30, %31 : vector<8x128xf32>
    %33 = arith.negf %32 : vector<8x128xf32>
    %34 = math.exp %33 : vector<8x128xf32>
    %cst_18 = arith.constant 1.000000e+00 : f32
    %35 = vector.broadcast %cst_18 : f32 to vector<8x128xf32>
    %36 = arith.addf %35, %34 : vector<8x128xf32>
    %37 = arith.divf %35, %36 : vector<8x128xf32>
    %38 = vector.extract_strided_slice %17 {offsets = [0, 256], sizes = [8, 128], strides = [1, 1]} : vector<8x384xf32> to vector<8x128xf32>
    %39 = vector.extract_strided_slice %21 {offsets = [0, 256], sizes = [8, 128], strides = [1, 1]} : vector<8x384xf32> to vector<8x128xf32>
    %40 = arith.mulf %29, %39 : vector<8x128xf32>
    %41 = arith.addf %38, %40 : vector<8x128xf32>
    %42 = math.tanh %41 : vector<8x128xf32>
    %cst_19 = arith.constant 1.000000e+00 : f32
    %43 = vector.broadcast %cst_19 : f32 to vector<8x128xf32>
    %44 = arith.subf %43, %37 : vector<8x128xf32>
    %45 = arith.mulf %44, %42 : vector<8x128xf32>
    %46 = arith.mulf %37, %13 : vector<8x128xf32>
    %47 = arith.addf %45, %46 : vector<8x128xf32>
    %48 = vector.shape_cast %5 : vector<8x1xi1> to vector<8x1xi1>
    %49 = vector.broadcast %48 : vector<8x1xi1> to vector<8x128xi1>
    %50 = arith.select %49, %47, %13 : vector<8x128xi1>, vector<8x128xf32>
    %c0_20 = arith.constant 0 : index
    %c0_21 = arith.constant 0 : index
    %c0_22 = arith.constant 0 : index
    %51 = vector.load %arg12[%c0_20, %c0_21, %c0_22] : memref<2x8x128xf32, #tpu.memory_space<vmem>>, vector<1x8x128xf32>
    %52 = vector.shape_cast %51 : vector<1x8x128xf32> to vector<8x128xf32>
    %53 = vector.shape_cast %50 : vector<8x128xf32> to vector<1x8x128xf32>
    tpu.vector_store %arg12[%c0_20, %c0_21, %c0_22], %53 {strides = array<i32>} : memref<2x8x128xf32, #tpu.memory_space<vmem>>, vector<1x8x128xf32>,
    %c0_23 = arith.constant 0 : index
    %c0_24 = arith.constant 0 : index
    %54 = vector.load %arg7[%c0_23, %c0_24] : memref<128x384xbf16, #tpu.memory_space<vmem>>, vector<128x384xbf16>
    %c0_25 = arith.constant 0 : index
    %c0_26 = arith.constant 0 : index
    %55 = vector.load %arg8[%c0_25, %c0_26] : memref<128x384xbf16, #tpu.memory_space<vmem>>, vector<128x384xbf16>
    %c0_27 = arith.constant 0 : index
    %c0_28 = arith.constant 0 : index
    %56 = vector.load %arg9[%c0_27, %c0_28] : memref<1x384xf32, #tpu.memory_space<vmem>>, vector<1x384xf32>
    %c0_29 = arith.constant 0 : index
    %c0_30 = arith.constant 0 : index
    %57 = vector.load %arg10[%c0_29, %c0_30] : memref<1x384xf32, #tpu.memory_space<vmem>>, vector<1x384xf32>
    %c1 = arith.constant 1 : index
    %c0_31 = arith.constant 0 : index
    %c0_32 = arith.constant 0 : index
    %58 = vector.load %arg12[%c1, %c0_31, %c0_32] : memref<2x8x128xf32, #tpu.memory_space<vmem>>, vector<1x8x128xf32>
    %59 = vector.shape_cast %58 : vector<1x8x128xf32> to vector<8x128xf32>
    %60 = arith.truncf %50 : vector<8x128xf32> to vector<8x128xbf16>
    %cst_33 = arith.constant dense<0.000000e+00> : vector<8x384xf32>
    %61 = tpu.matmul %60, %54, %cst_33 {dimension_numbers = #tpu.dot_dimension_numbers<[1], [0], [0], [1], [0, 0, 1, 1], [], []>} : vector<8x128xbf16>, vector<128x384xbf16>, vector<8x384xf32> -> vector<8x384xf32>
    %62 = vector.broadcast %56 : vector<1x384xf32> to vector<8x384xf32>
    %63 = arith.addf %61, %62 : vector<8x384xf32>
    %64 = arith.truncf %59 : vector<8x128xf32> to vector<8x128xbf16>
    %cst_34 = arith.constant dense<0.000000e+00> : vector<8x384xf32>
    %65 = tpu.matmul %64, %55, %cst_34 {dimension_numbers = #tpu.dot_dimension_numbers<[1], [0], [0], [1], [0, 0, 1, 1], [], []>} : vector<8x128xbf16>, vector<128x384xbf16>, vector<8x384xf32> -> vector<8x384xf32>
    %66 = vector.broadcast %57 : vector<1x384xf32> to vector<8x384xf32>
    %67 = arith.addf %65, %66 : vector<8x384xf32>
    %68 = vector.extract_strided_slice %63 {offsets = [0, 0], sizes = [8, 128], strides = [1, 1]} : vector<8x384xf32> to vector<8x128xf32>
    %69 = vector.extract_strided_slice %67 {offsets = [0, 0], sizes = [8, 128], strides = [1, 1]} : vector<8x384xf32> to vector<8x128xf32>
    %70 = arith.addf %68, %69 : vector<8x128xf32>
    %71 = arith.negf %70 : vector<8x128xf32>
    %72 = math.exp %71 : vector<8x128xf32>
    %cst_35 = arith.constant 1.000000e+00 : f32
    %73 = vector.broadcast %cst_35 : f32 to vector<8x128xf32>
    %74 = arith.addf %73, %72 : vector<8x128xf32>
    %75 = arith.divf %73, %74 : vector<8x128xf32>
    %76 = vector.extract_strided_slice %63 {offsets = [0, 128], sizes = [8, 128], strides = [1, 1]} : vector<8x384xf32> to vector<8x128xf32>
    %77 = vector.extract_strided_slice %67 {offsets = [0, 128], sizes = [8, 128], strides = [1, 1]} : vector<8x384xf32> to vector<8x128xf32>
    %78 = arith.addf %76, %77 : vector<8x128xf32>
    %79 = arith.negf %78 : vector<8x128xf32>
    %80 = math.exp %79 : vector<8x128xf32>
    %cst_36 = arith.constant 1.000000e+00 : f32
    %81 = vector.broadcast %cst_36 : f32 to vector<8x128xf32>
    %82 = arith.addf %81, %80 : vector<8x128xf32>
    %83 = arith.divf %81, %82 : vector<8x128xf32>
    %84 = vector.extract_strided_slice %63 {offsets = [0, 256], sizes = [8, 128], strides = [1, 1]} : vector<8x384xf32> to vector<8x128xf32>
    %85 = vector.extract_strided_slice %67 {offsets = [0, 256], sizes = [8, 128], strides = [1, 1]} : vector<8x384xf32> to vector<8x128xf32>
    %86 = arith.mulf %75, %85 : vector<8x128xf32>
    %87 = arith.addf %84, %86 : vector<8x128xf32>
    %88 = math.tanh %87 : vector<8x128xf32>
    %cst_37 = arith.constant 1.000000e+00 : f32
    %89 = vector.broadcast %cst_37 : f32 to vector<8x128xf32>
    %90 = arith.subf %89, %83 : vector<8x128xf32>
    %91 = arith.mulf %90, %88 : vector<8x128xf32>
    %92 = arith.mulf %83, %59 : vector<8x128xf32>
    %93 = arith.addf %91, %92 : vector<8x128xf32>
    %94 = vector.shape_cast %5 : vector<8x1xi1> to vector<8x1xi1>
    %95 = vector.broadcast %94 : vector<8x1xi1> to vector<8x128xi1>
    %96 = arith.select %95, %93, %59 : vector<8x128xi1>, vector<8x128xf32>
    %c1_38 = arith.constant 1 : index
    %c0_39 = arith.constant 0 : index
    %c0_40 = arith.constant 0 : index
    %97 = vector.load %arg12[%c1_38, %c0_39, %c0_40] : memref<2x8x128xf32, #tpu.memory_space<vmem>>, vector<1x8x128xf32>
    %98 = vector.shape_cast %97 : vector<1x8x128xf32> to vector<8x128xf32>
    %99 = vector.shape_cast %96 : vector<8x128xf32> to vector<1x8x128xf32>
    tpu.vector_store %arg12[%c1_38, %c0_39, %c0_40], %99 {strides = array<i32>} : memref<2x8x128xf32, #tpu.memory_space<vmem>>, vector<1x8x128xf32>,
    %cst_41 = arith.constant 0.000000e+00 : f32
    %100 = vector.shape_cast %5 : vector<8x1xi1> to vector<8x1xi1>
    %101 = vector.broadcast %100 : vector<8x1xi1> to vector<8x128xi1>
    %102 = vector.broadcast %cst_41 : f32 to vector<8x128xf32>
    %103 = arith.select %101, %96, %102 : vector<8x128xi1>, vector<8x128xf32>
    %c0_42 = arith.constant 0 : index
    %c0_43 = arith.constant 0 : index
    %c0_44 = arith.constant 0 : index
    %104 = vector.load %arg11[%c0_42, %c0_43, %c0_44] : memref<1x8x128xf32, #tpu.memory_space<vmem>>, vector<1x8x128xf32>
    %105 = vector.shape_cast %104 : vector<1x8x128xf32> to vector<8x128xf32>
    %106 = vector.shape_cast %103 : vector<8x128xf32> to vector<1x8x128xf32>
    tpu.vector_store %arg11[%c0_42, %c0_43, %c0_44], %106 {strides = array<i32>} : memref<1x8x128xf32, #tpu.memory_space<vmem>>, vector<1x8x128xf32>,
    return
  }
  func.func @transform_0(%arg0: i32) -> (i32, i32, i32) {
    %c0_i32 = arith.constant 0 : i32
    %c0_i32_0 = arith.constant 0 : i32
    %c0_i32_1 = arith.constant 0 : i32
    return %arg0, %c0_i32, %c0_i32_0 : i32, i32, i32
  }
  func.func @transform_1(%arg0: i32) -> (i32, i32) {
    %c0_i32 = arith.constant 0 : i32
    %c0_i32_0 = arith.constant 0 : i32
    %c0_i32_1 = arith.constant 0 : i32
    return %c0_i32, %c0_i32_0 : i32, i32
  }
  func.func @transform_2(%arg0: i32) -> (i32, i32) {
    %c0_i32 = arith.constant 0 : i32
    %c0_i32_0 = arith.constant 0 : i32
    %c0_i32_1 = arith.constant 0 : i32
    return %c0_i32, %c0_i32_0 : i32, i32
  }
  func.func @transform_3(%arg0: i32) -> (i32, i32) {
    %c0_i32 = arith.constant 0 : i32
    %c0_i32_0 = arith.constant 0 : i32
    %c0_i32_1 = arith.constant 0 : i32
    return %c0_i32, %c0_i32_0 : i32, i32
  }
  func.func @transform_4(%arg0: i32) -> (i32, i32) {
    %c0_i32 = arith.constant 0 : i32
    %c0_i32_0 = arith.constant 0 : i32
    %c0_i32_1 = arith.constant 0 : i32
    return %c0_i32, %c0_i32_0 : i32, i32
  }
  func.func @transform_5(%arg0: i32) -> (i32, i32) {
    %c0_i32 = arith.constant 0 : i32
    %c0_i32_0 = arith.constant 0 : i32
    %c0_i32_1 = arith.constant 0 : i32
    return %c0_i32, %c0_i32_0 : i32, i32
  }
  func.func @transform_6(%arg0: i32) -> (i32, i32) {
    %c0_i32 = arith.constant 0 : i32
    %c0_i32_0 = arith.constant 0 : i32
    %c0_i32_1 = arith.constant 0 : i32
    return %c0_i32, %c0_i32_0 : i32, i32
  }
  func.func @transform_7(%arg0: i32) -> (i32, i32) {
    %c0_i32 = arith.constant 0 : i32
    %c0_i32_0 = arith.constant 0 : i32
    %c0_i32_1 = arith.constant 0 : i32
    return %c0_i32, %c0_i32_0 : i32, i32
  }
  func.func @transform_8(%arg0: i32) -> (i32, i32) {
    %c0_i32 = arith.constant 0 : i32
    %c0_i32_0 = arith.constant 0 : i32
    %c0_i32_1 = arith.constant 0 : i32
    return %c0_i32, %c0_i32_0 : i32, i32
  }
  func.func @transform_9(%arg0: i32) -> (i32, i32) {
    %c0_i32 = arith.constant 0 : i32
    %c0_i32_0 = arith.constant 0 : i32
    %c0_i32_1 = arith.constant 0 : i32
    return %c0_i32, %c0_i32_0 : i32, i32
  }
  func.func @transform_10(%arg0: i32) -> (i32, i32, i32) {
    %c0_i32 = arith.constant 0 : i32
    %c0_i32_0 = arith.constant 0 : i32
    %c0_i32_1 = arith.constant 0 : i32
    return %arg0, %c0_i32, %c0_i32_0 : i32, i32, i32
  }
  func.func @transform_11(%arg0: i32) -> (i32, i32, i32) {
    %c0_i32 = arith.constant 0 : i32
    %c0_i32_0 = arith.constant 0 : i32
    %c0_i32_1 = arith.constant 0 : i32
    %c0_i32_2 = arith.constant 0 : i32
    return %c0_i32, %c0_i32_0, %c0_i32_1 : i32, i32, i32
  }
}

</mosaic_0001>

<bundles_post_ra>
// kernel: rnn_encoder_forward.1
= control target key start
LH: loop header
LB: loop body
LE: loop exit
PB: predicated region body
PF: predicated region fallthrough
CT: control target
= control target key end

     0   :  { %17 = vsyncpa [#allocation3], 0  ;;  %s3017_s0 = inlined_call_operand.vmem [shape: f32[8,8,128], index: 0, kind: input, shape index: {}]   ;;  %s3018_s1 = inlined_call_operand.vmem [shape: s32[8,1], index: 1, kind: input, shape index: {}]   ;;  %s3019_s2 = inlined_call_operand.vmem [shape: bf16[128,384], index: 2, kind: input, shape index: {}]   ;;  %s3020_s3 = inlined_call_operand.vmem [shape: bf16[128,384], index: 3, kind: input, shape index: {}]   ;;  %s3021_s4 = inlined_call_operand.hbm [shape: f32[1,384], index: 4, kind: input, shape index: {}]   ;;  %s3022_s5 = inlined_call_operand.hbm [shape: f32[1,384], index: 5, kind: input, shape index: {}]   ;;  %s3023_s6 = inlined_call_operand.vmem [shape: bf16[128,384], index: 6, kind: input, shape index: {}]   ;;  %s3024_s7 = inlined_call_operand.vmem [shape: bf16[128,384], index: 7, kind: input, shape index: {}]   ;;  %s3025_s8 = inlined_call_operand.hbm [shape: f32[1,384], index: 8, kind: input, shape index: {}]   ;;  %s3026_s9 = inlined_call_operand.vmem [shape: f32[1,384], index: 9, kind: input, shape index: {}]   ;;  %s3027_s10 = inlined_call_operand.hbm [shape: f32[8,8,128], index: 10, kind: output, shape index: {0}]   ;;  %s3028_s11 = inlined_call_operand.hbm [shape: f32[2,8,128], index: 11, kind: output, shape index: {1}]  }
   0x1   :  { %18 = vsyncpa [#allocation6], 0 }
   0x2   :  { %19 = vsyncpa [#allocation4], 0 }
   0x3   :  { %21 = vsyncpa [#allocation4 + $0x1], 0 }
   0x4   :  { %22 = vsyncpa [#allocation10], 0  ;;  %s2390_s17 = smov 0   ;;  %s2392_s18 = smov 0  }
   0x5   :  { %s2394_s19 = smov 0   ;;  %s2396_s20 = smov 0  }
   0x6 LB: > { %3038 = sst [smem:[#allocation15_spill]] %s2305_s17  ;;  %s2411_s21 = sadd.s32 4294967295, %s2317_s20   ;;  %s2317_s20 = sphi %s2396_s20, %s3063_s20   ;;  %s2313_s19 = sphi %s2394_s19, %s3065_s19   ;;  %s2309_s18 = sphi %s2392_s18, %s3067_s18   ;;  %s2305_s17 = sphi %s2390_s17, %s3066_s17  }
   0x7   : > { %3039 = sst [smem:[#allocation16_spill]] %s2313_s19  ;;  %s1650_s22 = sadd.s32 4294967294, %s2317_s20  }
   0x8   : > { %s2415_s23 = sadd.s32 1, %s2317_s20   ;;  %s250_s24 = sadd.s32 1, %s2313_s19 }
   0x9   : > { %3040 = sst [smem:[#allocation17_spill]] %s2415_s23  ;;  %s247_s25 = ssub.s32 %s2317_s20, %s2415_s23 }
   0xa   : > { %p260_p0 = scmp.ne.s32.totalorder %s2313_s19, %s2309_s18  ;;  %p248_p1 = scmp.eq.s32.totalorder %s247_s25, 0 }
   0xb   : > { %p3032_p2 = scmp.eq.s32.totalorder %s2411_s21, 7  ;;  %p266_p3 = scmp.ne.s32.totalorder %s2309_s18, %s2305_s17 }
   0xc   : > { %p267_p4 = scmp.eq.s32.totalorder %s1650_s22, 7  ;;  %p1651_p7 = scmp.ge.s32.totalorder %s2317_s20, 1 }
   0xd   : > { %s2426_s26 = scalar_select %p248_p1, %s2313_s19, %s250_s24  }
   0xe   : > { %p2430_p5 = por %p3032_p2, %p260_p0  ;;  %p2434_p6 = por %p267_p4, %p266_p3 }
   0xf   : > { %3041 = sst [smem:[#allocation18_spill]] %s2426_s26  ;;  %p295_p8 = scmp.lt.s32.totalorder %s2317_s20, 9 }
  0x10   : > { %s3042_s27 = scalar_select %p2430_p5, 1, 0 }
  0x11   : > { %s3043_s28 = scalar_select %p2434_p6, 1, 0 }
  0x12   : > { %p3033_p10 = scmp.eq.s32.totalorder %s2411_s21, 0  ;;  %p2442_p11 = pnand %p1651_p7, %p295_p8 }
  0x13   : > { %3044 = sst [smem:[#allocation19_spill]] %s3043_s28  ;;  %s2319_s30 = smov [#allocation5]  }
  0x14   : > { %s3045_s29 = scalar_select %p2442_p11, 1, 0 }
  0x15   : > { %s328_s12 = sshll.u32 %s2319_s30, 4  ;;  %p1919_p12 = pneg %p2442_p11  ;;  %s329_s12 = int_to_ptr.vmem [resolvable:$true] %s328_s12 }
  0x16   : > { %s2320_s13 = smov [#allocation2]   ;;  %s2321_s16 = smov [#allocation7]  }
  0x17   : > { %s317_s14 = sshll.u32 %s2320_s13, 4  ;;  %p2450_p13 = pnand %p3033_p10, %p1919_p12  ;;  %s2454_s14 = int_to_ptr.vmem [resolvable:$true] %s317_s14 }
  0x18   : > { %s345_s22 = sshll.u32 %s2321_s16, 4  ;;  %s2133_s30 = scalar_lea.hbm %s3022_s5, 48  ;;  %s2456_s22 = int_to_ptr.vmem [resolvable:$true] %s345_s22 }
  0x19   : > { %p2134_p0 = scmp.ne.s32.totalorder %s3022_s5, %s2133_s30  ;;  %p2466_p1 = pneg %p2450_p13 }
  0x1a   : > { %p2140_p7 = scmp.lt.u32.totalorder %s2133_s30, %s3022_s5 }
  0x1b   : > { %p2136_p3 = pnand %p2466_p1, %p2134_p0 }
  0x1d   : > { %p2137_p4 = pneg %p2136_p3 }
  0x1f   : > { %p2142_p8 = pnand %p2140_p7, %p2137_p4 }
  0x21   : > { %2145 = shalt.err (!%p2142_p8)
}
  0x22   : > { %s2146_s24 = scalar_lea.vmem %s329_s12, 48  ;;  %s2153_s19 = scalar_lea.vmem %s329_s12, 64 }
  0x23   : > { %p2147_p12 = scmp.ne.s32.totalorder %s329_s12, %s2146_s24  ;;  %p2154_p10 = scmp.lt.s32.totalorder %s329_s12, %s329_s12 }
  0x24   : > { %p2155_p6 = scmp.lt.s32.totalorder %s2153_s19, %s2146_s24 }
  0x25   : > { %p2149_p2 = pnand %p2147_p12, %p2466_p1 }
  0x26   : > { %p2156_p5 = por %p2155_p6, %p2154_p10 }
  0x27   : > { %p2150_p9 = pneg %p2149_p2 }
  0x29   : > { %p2157_p11 = pnand %p2156_p5, %p2150_p9 }
  0x2b   : > { %2160 = shalt.err (!%p2157_p11)
}
  0x2c   : > { %1925 = dma.hbm_to_vmem [thread:$0]  (!%p2450_p13), %s3022_s5, 48, %s329_s12, [#allocation6]  }
  0x2d   : > { %s2161_s16 = scalar_lea.hbm %s3021_s4, 48 }
  0x2e   : > { %p2162_p2 = scmp.ne.s32.totalorder %s3021_s4, %s2161_s16  ;;  %p2168_p5 = scmp.lt.u32.totalorder %s2161_s16, %s3021_s4 }
  0x30   : > { %p2164_p0 = pnand %p2162_p2, %p2466_p1 }
  0x32   : > { %p2165_p6 = pneg %p2164_p0 }
  0x34   : > { %p2170_p9 = pnand %p2168_p5, %p2165_p6 }
  0x36   : > { %2173 = shalt.err (!%p2170_p9)
}
  0x37   : > { %s2174_s12 = scalar_lea.vmem %s2454_s14, 48  ;;  %s2181_s17 = scalar_lea.vmem %s2454_s14, 64 }
  0x38   : > { %p2175_p10 = scmp.ne.s32.totalorder %s2454_s14, %s2174_s12  ;;  %p2182_p4 = scmp.lt.s32.totalorder %s2454_s14, %s2454_s14 }
  0x39   : > { %p2183_p7 = scmp.lt.s32.totalorder %s2181_s17, %s2174_s12 }
  0x3a   : > { %p2177_p11 = pnand %p2175_p10, %p2466_p1 }
  0x3b   : > { %p2184_p8 = por %p2183_p7, %p2182_p4 }
  0x3c   : > { %p2178_p3 = pneg %p2177_p11 }
  0x3e   : > { %p2185_p12 = pnand %p2184_p8, %p2178_p3 }
  0x40   : > { %2188 = shalt.err (!%p2185_p12)
}
  0x41   : > { %1922 = dma.hbm_to_vmem [thread:$0]  (!%p2450_p13), %s3021_s4, 48, %s2454_s14, [#allocation3]  }
  0x42   : > { %s2189_s30 = scalar_lea.hbm %s3025_s8, 48 }
  0x43   : > { %p2190_p2 = scmp.ne.s32.totalorder %s3025_s8, %s2189_s30  ;;  %p2196_p5 = scmp.lt.u32.totalorder %s2189_s30, %s3025_s8 }
  0x45   : > { %p2192_p0 = pnand %p2190_p2, %p2466_p1 }
  0x47   : > { %p2193_p6 = pneg %p2192_p0 }
  0x49   : > { %p2198_p9 = pnand %p2196_p5, %p2193_p6 }
  0x4b   : > { %2201 = shalt.err (!%p2198_p9)
}
  0x4c   : > { %s2202_s14 = scalar_lea.vmem %s2456_s22, 48  ;;  %s2209_s17 = scalar_lea.vmem %s2456_s22, 64 }
  0x4d   : > { %p2203_p10 = scmp.ne.s32.totalorder %s2456_s22, %s2202_s14  ;;  %p2210_p4 = scmp.lt.s32.totalorder %s2456_s22, %s2456_s22 }
  0x4e   : > { %p2211_p7 = scmp.lt.s32.totalorder %s2209_s17, %s2202_s14 }
  0x4f   : > { %p2205_p11 = pnand %p2203_p10, %p2466_p1 }
  0x50   : > { %p2212_p8 = por %p2211_p7, %p2210_p4 }
  0x51   : > { %p2206_p3 = pneg %p2205_p11 }
  0x53   : > { %p2213_p12 = pnand %p2212_p8, %p2206_p3 }
  0x55   : > { %2216 = shalt.err (!%p2213_p12)
}
  0x56   : > { %1928 = dma.hbm_to_vmem [thread:$0]  (!%p2450_p13), %s3025_s8, 48, %s2456_s22, [#allocation6]  }
  0x57   : > { %p3048_p2 = scmp.ne.s32.totalorder %s3045_s29, 0 }
  0x58   : > { %p3049_p1 = scmp.eq.s32.totalorder (!%p3048_p2), %s2411_s21, 0 }
  0x59   : > { %368 = sbr.rel (%p3048_p2) target bundleno = 773 (0x305), region = 60 }
  0x60   : > { %2288 = dma.done.wait (%p3049_p1), [#allocation3], 48   ;;  %p3050_p0 = pmov %p3049_p1 }
  0x62   : > { %2290 = vsyncadd (%p3050_p0), [#allocation3], 4294967248  ;;  %p3051_p6 = pmov %p3050_p0 }
  0x63   : > { %p3052_p5 = pmov %p3050_p0 }
  0x64   : > { %2292 = dma.done.wait (%p3051_p6), [#allocation6], 96  }
  0x65   : > { %2294 = vsyncadd (%p3052_p5), [#allocation6], 4294967200  ;;  %s410_s15 = sand.u32 1, %s2309_s18   ;;  %p415_p13 = scmp.lt.s32.totalorder %s2411_s21, 7 }
  0x66   : > { %s2544_s29 = sshll.u32 %s410_s15, 3  ;;  %p3053_p9 = scmp.ne.s32.totalorder %s2411_s21, 0 }
  0x67   : > { %s416_s22 = scalar_select %p415_p13, %s2411_s21, 7 }
  0x68   : > { %s412_s16 = scalar_lea.vmem [#allocation8], %s2544_s29  ;;  %423 = sbr.rel (%p3053_p9) target bundleno = 111 (0x6f), region = 76  ;;  %v2322_v0 = vmov (!%p3053_p9), 0.0  }
  0x69   : > { %s1661_s13 = sshll.u32 %s416_s22, 3  ;;  %424 = vst [vmem:[#allocation9] sm:$0xff] (!%p3053_p9), %v2322_v0  ;;  %425 = vst [vmem:[#allocation9 + $0x8] sm:$0xff] (!%p3053_p9), %v2322_v0 }
  0x6a   : > { %s2550_s30 = scalar_lea.vmem %s3017_s0, %s1661_s13 }
  0x6f PF: > { %v1985_v1 = vld [vmem:[%s3019_s2 + $0x4] ss:$12 sps:$4 sm:$0xff]   ;;  %v1987_v2 = vld [vmem:[%s3019_s2] ss:$12 sps:$4 sm:$0xff]   ;;  %v2323_v3 = vmov 0.0   ;;  %v2324_v4 = vmov 0   ;;  %v427_v34 = vstv %s2411_s21 }
  0x70   : > { %1805 = vmatprep.subr.bf16.mxu1 %v2323_v3  ;;  %674 = vmatprep.mubr.bf16.mxu0 %v2324_v4  ;;  %v1988_v5 = vld [vmem:[%s3019_s2 + $0x1c] ss:$12 sps:$4 sm:$0xff]   ;;  %vm2325_vm0 = vmmov 0   ;;  %v1990_v6 = vld [vmem:[%s3019_s2 + $0x18] ss:$12 sps:$4 sm:$0xff]   ;;  %s1764_s22 = sshll.u32 %s2411_s21, 7 }
  0x71   : > { %642 = vmatprep.subr.bf16.mxu0 %v1985_v1  ;;  %1821 = vmatprep.mubr.msk.bf16.mxu1 %vm2325_vm0, %v2323_v3  ;;  %v1991_v7 = vld [vmem:[%s3019_s2 + $0x34] ss:$12 sps:$4 sm:$0xff]   ;;  %v1993_v8 = vld [vmem:[%s3019_s2 + $0x30] ss:$12 sps:$4 sm:$0xff]   ;;  %v1994_v9 = vld [vmem:[%s3019_s2 + $0x4c] ss:$12 sps:$4 sm:$0xff]   ;;  %s2937_s12 = scalar_lea.hbm %s3027_s10, %s1764_s22 }
  0x72   : > { %643 = vmatpush1.bf16.msra.mxu0 %v1987_v2  ;;  %1984 = vset.pattern.permute.xlu0 %v2324_v4  ;;  %v2005_v10 = vld [vmem:[%s3019_s2 + $0x8] ss:$12 sps:$4 sm:$0xff]   ;;  %v1997_v12 = vld [vmem:[%s3019_s2 + $0x64] ss:$12 sps:$4 sm:$0xff]   ;;  %v2009_v13 = vld [vmem:[%s3019_s2 + $0x20] ss:$12 sps:$4 sm:$0xff]  }
  0x73   : > { %644 = vmatprep.subr.bf16.mxu0 %v1988_v5  ;;  %v1996_v11 = vld [vmem:[%s3019_s2 + $0x48] ss:$12 sps:$4 sm:$0xff]   ;;  %1806 = vmatpush3.bf16.msra.mxu1 %v2005_v10  ;;  %v1999_v14 = vld [vmem:[%s3019_s2 + $0x60] ss:$12 sps:$4 sm:$0xff]   ;;  %v2011_v15 = vld [vmem:[%s3019_s2 + $0x38] ss:$12 sps:$4 sm:$0xff]  }
  0x74   : > { %1807 = vmatprep.subr.bf16.mxu1 %v2323_v3  ;;  %v2000_v16 = vld [vmem:[%s3019_s2 + $0x7c] ss:$12 sps:$4 sm:$0xff]   ;;  %v2002_v17 = vld [vmem:[%s3019_s2 + $0x78] ss:$12 sps:$4 sm:$0xff]   ;;  %v2003_v19 = vld [vmem:[%s3019_s2 + $0x94] ss:$12 sps:$4 sm:$0xff]  }
  0x75   : > { %v2015_v18 = vld [vmem:[%s3019_s2 + $0x50] ss:$12 sps:$4 sm:$0xff]   ;;  %v2019_v21 = vld [vmem:[%s3019_s2 + $0x68] ss:$12 sps:$4 sm:$0xff]   ;;  %v2007_v22 = vld [vmem:[%s3019_s2 + $0xac] ss:$12 sps:$4 sm:$0xff]  }
  0x76   : > { %645 = vmatpush1.bf16.msra.mxu0 %v1990_v6  ;;  %v2006_v20 = vld [vmem:[%s3019_s2 + $0x90] ss:$12 sps:$4 sm:$0xff]   ;;  %v2010_v23 = vld [vmem:[%s3019_s2 + $0xa8] ss:$12 sps:$4 sm:$0xff]   ;;  %v429_v24 = vld [vmem:[%s2550_s30] sm:$0xff]  ;;  %s1536_s13 = sshll.u32 %s412_s16, 4  ;;  %s2939_s13 = int_to_ptr.vmem [resolvable:$true] %s1536_s13 }
  0x77   : > { %646 = vmatprep.subr.bf16.mxu0 %v1991_v7  ;;  %1808 = vmatpush3.bf16.msra.mxu1 %v2009_v13  ;;  %v2023_v25 = vld [vmem:[%s3019_s2 + $0x80] ss:$12 sps:$4 sm:$0xff]   ;;  %v2014_v26 = vld [vmem:[%s3020_s3 + $0x4] ss:$12 sps:$4 sm:$0xff]   ;;  %v497_v27 = vpack.c.bf16 %v429_v24, %v429_v24  ;;  %v2018_v30 = vld [vmem:[%s3020_s3 + $0x1c] ss:$12 sps:$4 sm:$0xff]  }
  0x78   : > { %1809 = vmatprep.subr.bf16.mxu1 %v2323_v3  ;;  %v2012_v28 = vld [vmem:[%s3020_s3] ss:$12 sps:$4 sm:$0xff]   ;;  %v2027_v29 = vld [vmem:[%s3019_s2 + $0x98] ss:$12 sps:$4 sm:$0xff]   ;;  %v2031_v32 = vld [vmem:[%s3019_s2 + $0xb0] ss:$12 sps:$4 sm:$0xff]  }
  0x79   : > { %v2016_v31 = vld [vmem:[%s3020_s3 + $0x18] ss:$12 sps:$4 sm:$0xff]   ;;  %v2022_v33 = vld [vmem:[%s3020_s3 + $0x34] ss:$12 sps:$4 sm:$0xff]   ;;  %v2020_v35 = vld [vmem:[%s3020_s3 + $0x30] ss:$12 sps:$4 sm:$0xff]  }
  0x7a   : > { %647 = vmatpush1.bf16.msra.mxu0 %v1993_v8  ;;  %v2026_v36 = vld [vmem:[%s3020_s3 + $0x4c] ss:$12 sps:$4 sm:$0xff]   ;;  %v2038_v37 = vld [vmem:[%s3020_s3 + $0x8] ss:$12 sps:$4 sm:$0xff]   ;;  %v426_v38 = vld [vmem:[%s3018_s1] sm:$0xff]  ;;  %s2326_s25 = smov [#allocation9]  }
  0x7b   : > { %648 = vmatprep.subr.bf16.mxu0 %v1994_v9  ;;  %1810 = vmatpush3.bf16.msra.mxu1 %v2011_v15  ;;  %vm428_vm1 = vcmp.lt.s32.totalorder %v427_v34, %v426_v38  ;;  %v2024_v40 = vld [vmem:[%s3020_s3 + $0x48] ss:$12 sps:$4 sm:$0xff]   ;;  %v2042_v41 = vld [vmem:[%s3020_s3 + $0x20] ss:$12 sps:$4 sm:$0xff]   ;;  %v2030_v42 = vld [vmem:[%s3020_s3 + $0x64] ss:$12 sps:$4 sm:$0xff]  }
  0x7c   : > { %1811 = vmatprep.subr.bf16.mxu1 %v2323_v3  ;;  %v970_v39 = vsel %vm428_vm1, 1, %v2324_v4  ;;  %v2028_v43 = vld [vmem:[%s3020_s3 + $0x60] ss:$12 sps:$4 sm:$0xff]   ;;  %v2043_v44 = vld [vmem:[%s3020_s3 + $0x38] ss:$12 sps:$4 sm:$0xff]   ;;  %s1546_s23 = sshll.u32 %s2326_s25, 4  ;;  %s2941_s23 = int_to_ptr.vmem [resolvable:$true] %s1546_s23 }
  0x7d   : > { %972 = vperm.xlu0 %1984, %v970_v39   ;;  %v2034_v45 = vld [vmem:[%s3020_s3 + $0x7c] ss:$12 sps:$4 sm:$0xff]   ;;  %v2032_v46 = vld [vmem:[%s3020_s3 + $0x78] ss:$12 sps:$4 sm:$0xff]   ;;  %v2037_v48 = vld [vmem:[%s3020_s3 + $0x94] ss:$12 sps:$4 sm:$0xff]  }
  0x7e   : > { %649 = vmatpush1.bf16.msra.mxu0 %v1996_v11  ;;  %v2044_v47 = vld [vmem:[%s3020_s3 + $0x50] ss:$12 sps:$4 sm:$0xff]   ;;  %v2045_v50 = vld [vmem:[%s3020_s3 + $0x68] ss:$12 sps:$4 sm:$0xff]   ;;  %v2041_v51 = vld [vmem:[%s3020_s3 + $0xac] ss:$12 sps:$4 sm:$0xff]  }
  0x7f   : > { %650 = vmatprep.subr.bf16.mxu0 %v1997_v12  ;;  %1812 = vmatpush3.bf16.msra.mxu1 %v2015_v18  ;;  %v2035_v49 = vld [vmem:[%s3020_s3 + $0x90] ss:$12 sps:$4 sm:$0xff]   ;;  %v2039_v52 = vld [vmem:[%s3020_s3 + $0xa8] ss:$12 sps:$4 sm:$0xff]   ;;  %v2046_v54 = vld [vmem:[%s3020_s3 + $0x80] ss:$12 sps:$4 sm:$0xff]  }
  0x80   : > { %1813 = vmatprep.subr.bf16.mxu1 %v2323_v3  ;;  %v2716_v53 = vld [vmem:[#allocation9] sm:$0xff]  ;;  %v2047_v56 = vld [vmem:[%s3020_s3 + $0x98] ss:$12 sps:$4 sm:$0xff]   ;;  %v2052_v60 = vld [vmem:[%s3023_s6 + $0x8] ss:$12 sps:$4 sm:$0xff]   ;;  %s1523_s14 = scalar_lea.sflag [#allocation4], %s410_s15 }
  0x81   : > { %v723_v55 = vpack.c.bf16 %v2716_v53, %v2716_v53  ;;  %v2048_v57 = vld [vmem:[%s3020_s3 + $0xb0] ss:$12 sps:$4 sm:$0xff]   ;;  %v2049_v59 = vld [vmem:[%s3023_s6] ss:$12 sps:$4 sm:$0xff]   ;;  %v2053_v61 = vld [vmem:[%s3023_s6 + $0x18] ss:$12 sps:$4 sm:$0xff]  }
  0x82   : > { %651 = vmatpush1.bf16.msra.mxu0 %v1999_v14  ;;  %v2051_v58 = vld [vmem:[%s3023_s6 + $0x4] ss:$12 sps:$4 sm:$0xff]   ;;  %v2055_v62 = vld [vmem:[%s3023_s6 + $0x1c] ss:$12 sps:$4 sm:$0xff]   ;;  %v2056_v63 = vld [vmem:[%s3023_s6 + $0x20] ss:$12 sps:$4 sm:$0xff]  }
  0x83   : > { %652 = vmatprep.subr.bf16.mxu0 %v2000_v16  ;;  %1814 = vmatpush3.bf16.msra.mxu1 %v2019_v21  ;;  %v2059_v0 = vld [vmem:[%s3023_s6 + $0x34] ss:$12 sps:$4 sm:$0xff]   ;;  %v2057_v1 = vld [vmem:[%s3023_s6 + $0x30] ss:$12 sps:$4 sm:$0xff]   ;;  %v2060_v2 = vld [vmem:[%s3023_s6 + $0x38] ss:$12 sps:$4 sm:$0xff]  }
  0x84   : > { %1815 = vmatprep.subr.bf16.mxu1 %v2323_v3  ;;  %v2063_v5 = vld [vmem:[%s3023_s6 + $0x4c] ss:$12 sps:$4 sm:$0xff]   ;;  %v2061_v6 = vld [vmem:[%s3023_s6 + $0x48] ss:$12 sps:$4 sm:$0xff]   ;;  %v2064_v7 = vld [vmem:[%s3023_s6 + $0x50] ss:$12 sps:$4 sm:$0xff]  }
  0x85   : > { %v2067_v8 = vld [vmem:[%s3023_s6 + $0x64] ss:$12 sps:$4 sm:$0xff]   ;;  %v2065_v9 = vld [vmem:[%s3023_s6 + $0x60] ss:$12 sps:$4 sm:$0xff]   ;;  %v2068_v10 = vld [vmem:[%s3023_s6 + $0x68] ss:$12 sps:$4 sm:$0xff]  }
  0x86   : > { %653 = vmatpush1.bf16.msra.mxu0 %v2002_v17  ;;  %v2071_v11 = vld [vmem:[%s3023_s6 + $0x7c] ss:$12 sps:$4 sm:$0xff]   ;;  %v2069_v12 = vld [vmem:[%s3023_s6 + $0x78] ss:$12 sps:$4 sm:$0xff]   ;;  %v2072_v13 = vld [vmem:[%s3023_s6 + $0x80] ss:$12 sps:$4 sm:$0xff]  }
  0x87   : > { %654 = vmatprep.subr.bf16.mxu0 %v2003_v19  ;;  %1816 = vmatpush3.bf16.msra.mxu1 %v2023_v25  ;;  %v2075_v14 = vld [vmem:[%s3023_s6 + $0x94] ss:$12 sps:$4 sm:$0xff]   ;;  %v2073_v15 = vld [vmem:[%s3023_s6 + $0x90] ss:$12 sps:$4 sm:$0xff]   ;;  %v2076_v16 = vld [vmem:[%s3023_s6 + $0x98] ss:$12 sps:$4 sm:$0xff]   ;;  %v499_v25 = vlaneseq }
  0x88   : > { %1817 = vmatprep.subr.bf16.mxu1 %v2323_v3  ;;  %v2079_v17 = vld [vmem:[%s3023_s6 + $0xac] ss:$12 sps:$4 sm:$0xff]   ;;  %v2077_v18 = vld [vmem:[%s3023_s6 + $0xa8] ss:$12 sps:$4 sm:$0xff]   ;;  %v2080_v19 = vld [vmem:[%s3023_s6 + $0xb0] ss:$12 sps:$4 sm:$0xff]  }
  0x89   : > { %s2217_s30 = scalar_lea.vmem %s2939_s13, 128  ;;  %p3054_p11 = scmp.ne.s32.totalorder %s3042_s27, 0 }
  0x8a   : > { %655 = vmatpush1.bf16.msra.mxu0 %v2006_v20  ;;  %v2083_v20 = vld [vmem:[%s3024_s7 + $0x4] ss:$12 sps:$4 sm:$0xff]   ;;  %p2218_p10 = scmp.ne.s32.totalorder %s2939_s13, %s2217_s30  ;;  %s2327_s17 = smov [#allocation8]  }
  0x8b   : > { %656 = vmatprep.subr.bf16.mxu0 %v2007_v22  ;;  %1818 = vmatpush3.bf16.msra.mxu1 %v2027_v29  ;;  %v494_v29 = vld [vmem:[#allocation2] sm:$0x7]  ;;  %s2221_s28 = sshll.u32 %s2327_s17, 4  ;;  %s2222_s28 = int_to_ptr.vmem [resolvable:$false] %s2221_s28 }
  0x8c   : > { %1819 = vmatprep.subr.bf16.mxu1 %v2323_v3  ;;  %p2219_p3 = pnand %p2218_p10, %p3054_p11  ;;  %s2223_s26 = scalar_lea.vmem %s2222_s28, 256 }
  0x8d   : > { %p2224_p7 = scmp.lt.s32.totalorder %s2939_s13, %s2222_s28  ;;  %p2225_p8 = scmp.lt.s32.totalorder %s2223_s26, %s2217_s30 }
  0x8e   : > { %657 = vmatpush1.bf16.msra.mxu0 %v2010_v23  ;;  %p2220_p4 = pneg %p2219_p3 }
  0x8f   : > { %868 = vmatprep.subr.bf16.mxu0 %v2014_v26  ;;  %1820 = vmatpush3.bf16.msra.mxu1 %v2031_v32  ;;  %v500_v26 = vshrl.u32 %v499_v25, 7  ;;  %v2099_v25 = vld [vmem:[%s3024_s7 + $0x90] ss:$12 sps:$4 sm:$0xff]   ;;  %p2226_p12 = por %p2225_p8, %p2224_p7 }
  0x90   : > { %1825 = vmatprep.subr.bf16.mxu1 %v2323_v3 }
  0x91   : > { %675 = vmatmul.mubr.bf16.vlgmr.msra.gmra.mrb[0].mxu0 %v497_v27  ;;  %p2227_p2 = pnand %p2226_p12, %p2220_p4 }
  0x92   : > { %869 = vmatpush1.bf16.msra.mxu0 %v2012_v28  ;;  %900 = vmatprep.mubr.bf16.mxu0 %v2324_v4  ;;  %v495_v28 = vld [vmem:[#allocation5] sm:$0x7] }
  0x93   : > { %870 = vmatprep.subr.bf16.mxu0 %v2018_v30  ;;  %1822 = vmatmul.mubr.bf16.vlgmr.msra.gmra.mrb[0].mxu1 %v497_v27  ;;  %v2819_v27 = vsub.s32 0, %v500_v26  ;;  %v2821_v30 = vsub.s32 1, %v500_v26 }
  0x94   : > { %1826 = vmatpush3.bf16.msra.mxu1 %v2038_v37  ;;  %1841 = vmatprep.mubr.msk.bf16.mxu1 %vm2325_vm0, %v2323_v3 }
  0x95   : > { %1827 = vmatprep.subr.bf16.mxu1 %v2323_v3  ;;  %v728_v32 = vrot.slane %v495_v28, %v2819_v27  ;;  %v732_v34 = vrot.slane %v495_v28, %v2821_v30 }
  0x96   : > { %871 = vmatpush1.bf16.msra.mxu0 %v2016_v31  ;;  %v502_v31 = vrot.slane %v494_v29, %v2819_v27 }
  0x97   : > { %872 = vmatprep.subr.bf16.mxu0 %v2022_v33  ;;  %v506_v33 = vrot.slane %v494_v29, %v2821_v30 }
  0x98   : > { %1828 = vmatpush3.bf16.msra.mxu1 %v2042_v41 }
  0x99   : > { %1829 = vmatprep.subr.bf16.mxu1 %v2323_v3  ;;  %v1887_v37 = vadd.f32 %v732_v34, %v506_v33 }
  0x9a   : > { %873 = vmatpush1.bf16.msra.mxu0 %v2020_v35  ;;  %v1885_v35 = vadd.f32 %v728_v32, %v502_v31  ;;  %v2913_v31 = vld [vmem:[#allocation9 + $0x8] sm:$0xff]  ;;  %v2112_v32 = vld [vmem:[%s3024_s7 + $0xb0] ss:$12 sps:$4 sm:$0xff]  }
  0x9b   : > { %874 = vmatprep.subr.bf16.mxu0 %v2026_v36  ;;  %v1271_v33 = vpack.c.bf16 %v2913_v31, %v2913_v31 }
  0x9c   : > { %1830 = vmatpush3.bf16.msra.mxu1 %v2043_v44 }
  0x9d   : > { %1831 = vmatprep.subr.bf16.mxu1 %v2323_v3 }
  0x9e   : > { %875 = vmatpush1.bf16.msra.mxu0 %v2024_v40 }
  0x9f   : > { %876 = vmatprep.subr.bf16.mxu0 %v2030_v42 }
  0xa0   : > { %1832 = vmatpush3.bf16.msra.mxu1 %v2044_v47 }
  0xa1   : > { %1833 = vmatprep.subr.bf16.mxu1 %v2323_v3 }
  0xa2   : > { %877 = vmatpush1.bf16.msra.mxu0 %v2028_v43 }
  0xa3   : > { %878 = vmatprep.subr.bf16.mxu0 %v2034_v45 }
  0xa4   : > { %1834 = vmatpush3.bf16.msra.mxu1 %v2045_v50 }
  0xa5   : > { %1835 = vmatprep.subr.bf16.mxu1 %v2323_v3 }
  0xa6   : > { %879 = vmatpush1.bf16.msra.mxu0 %v2032_v46 }
  0xa7   : > { %880 = vmatprep.subr.bf16.mxu0 %v2037_v48 }
  0xa8   : > { %1836 = vmatpush3.bf16.msra.mxu1 %v2046_v54 }
  0xa9   : > { %1837 = vmatprep.subr.bf16.mxu1 %v2323_v3 }
  0xaa   : > { %881 = vmatpush1.bf16.msra.mxu0 %v2035_v49 }
  0xab   : > { %882 = vmatprep.subr.bf16.mxu0 %v2041_v51  ;;  %v2827_v51 = vsub.s32 2, %v500_v26  ;;  %v2111_v26 = vld [vmem:[%s3024_s7 + $0x98] ss:$12 sps:$4 sm:$0xff]  }
  0xac   : > { %1838 = vmatpush3.bf16.msra.mxu1 %v2047_v56 }
  0xad   : > { %1839 = vmatprep.subr.bf16.mxu1 %v2323_v3 }
  0xae   : > { %883 = vmatpush1.bf16.msra.mxu0 %v2039_v52  ;;  %v736_v52 = vrot.slane %v495_v28, %v2827_v51  ;;  %v2105_v28 = vld [vmem:[%s3024_s7 + $0xac] ss:$12 sps:$4 sm:$0xff]  }
  0xaf   : > { %1190 = vmatprep.subr.bf16.mxu0 %v2051_v58 }
  0xb0   : > { %1840 = vmatpush3.bf16.msra.mxu1 %v2048_v57 }
  0xb1   : > { %901 = vmatmul.mubr.bf16.vlgmr.msra.gmra.mrb[0].mxu0 %v723_v55  ;;  %1845 = vmatprep.subr.bf16.mxu1 %v2323_v3 }
  0xb2   : > { %1222 = vmatprep.mubr.bf16.mxu0 %v2324_v4  ;;  %1191 = vmatpush1.bf16.msra.mxu0 %v2049_v59 }
  0xb3   : > { %1842 = vmatmul.mubr.bf16.vlgmr.msra.gmra.mrb[4].mxu1 %v723_v55  ;;  %1192 = vmatprep.subr.bf16.mxu0 %v2055_v62  ;;  %v510_v55 = vrot.slane %v494_v29, %v2827_v51  ;;  %v2103_v29 = vld [vmem:[%s3024_s7 + $0xa8] ss:$12 sps:$4 sm:$0xff]  }
  0xb4   : > { %1861 = vmatprep.mubr.msk.bf16.mxu1 %vm2325_vm0, %v2323_v3  ;;  %1846 = vmatpush3.bf16.msra.mxu1 %v2052_v60 }
  0xb5   : > { %1847 = vmatprep.subr.bf16.mxu1 %v2323_v3 }
  0xb6   : > { %1193 = vmatpush1.bf16.msra.mxu0 %v2053_v61 }
  0xb7   : > { %1194 = vmatprep.subr.bf16.mxu0 %v2059_v0 }
  0xb8   : > { %1848 = vmatpush3.bf16.msra.mxu1 %v2056_v63 }
  0xb9   : > { %1849 = vmatprep.subr.bf16.mxu1 %v2323_v3 }
  0xba   : > { %1195 = vmatpush1.bf16.msra.mxu0 %v2057_v1 }
  0xbb   : > { %1196 = vmatprep.subr.bf16.mxu0 %v2063_v5 }
  0xbc   : > { %1850 = vmatpush3.bf16.msra.mxu1 %v2060_v2 }
  0xbd   : > { %1851 = vmatprep.subr.bf16.mxu1 %v2323_v3 }
  0xbe   : > { %1197 = vmatpush1.bf16.msra.mxu0 %v2061_v6 }
  0xbf   : > { %1198 = vmatprep.subr.bf16.mxu0 %v2067_v8  ;;  %v2081_v8 = vld [vmem:[%s3024_s7] ss:$12 sps:$4 sm:$0xff]  }
  0xc0   : > { %1852 = vmatpush3.bf16.msra.mxu1 %v2064_v7 }
  0xc1   : > { %1853 = vmatprep.subr.bf16.mxu1 %v2323_v3 }
  0xc2   : > { %1199 = vmatpush1.bf16.msra.mxu0 %v2065_v9  ;;  %v2102_v9 = vld [vmem:[%s3024_s7 + $0x8] ss:$12 sps:$4 sm:$0xff]  }
  0xc3   : > { %1200 = vmatprep.subr.bf16.mxu0 %v2071_v11  ;;  %v2086_v11 = vld [vmem:[%s3024_s7 + $0x1c] ss:$12 sps:$4 sm:$0xff]  }
  0xc4   : > { %1854 = vmatpush3.bf16.msra.mxu1 %v2068_v10 }
  0xc5   : > { %1855 = vmatprep.subr.bf16.mxu1 %v2323_v3 }
  0xc6   : > { %1201 = vmatpush1.bf16.msra.mxu0 %v2069_v12  ;;  %v2106_v12 = vld [vmem:[%s3024_s7 + $0x20] ss:$12 sps:$4 sm:$0xff]  }
  0xc7   : > { %1202 = vmatprep.subr.bf16.mxu0 %v2075_v14  ;;  %v2087_v14 = vld [vmem:[%s3024_s7 + $0x30] ss:$12 sps:$4 sm:$0xff]  }
  0xc8   : > { %1856 = vmatpush3.bf16.msra.mxu1 %v2072_v13  ;;  %v2089_v13 = vld [vmem:[%s3024_s7 + $0x34] ss:$12 sps:$4 sm:$0xff]  }
  0xc9   : > { %1857 = vmatprep.subr.bf16.mxu1 %v2323_v3 }
  0xca   : > { %1203 = vmatpush1.bf16.msra.mxu0 %v2073_v15  ;;  %v2107_v15 = vld [vmem:[%s3024_s7 + $0x38] ss:$12 sps:$4 sm:$0xff]  }
  0xcb   : > { %1204 = vmatprep.subr.bf16.mxu0 %v2079_v17  ;;  %v2108_v17 = vld [vmem:[%s3024_s7 + $0x50] ss:$12 sps:$4 sm:$0xff]  }
  0xcc   : > { %1858 = vmatpush3.bf16.msra.mxu1 %v2076_v16  ;;  %v2092_v16 = vld [vmem:[%s3024_s7 + $0x4c] ss:$12 sps:$4 sm:$0xff]  }
  0xcd   : > { %1859 = vmatprep.subr.bf16.mxu1 %v2323_v3 }
  0xce   : > { %1205 = vmatpush1.bf16.msra.mxu0 %v2077_v18  ;;  %v2095_v18 = vld [vmem:[%s3024_s7 + $0x64] ss:$12 sps:$4 sm:$0xff]  }
  0xcf   : > { %1416 = vmatprep.subr.bf16.mxu0 %v2083_v20  ;;  %v2109_v20 = vld [vmem:[%s3024_s7 + $0x68] ss:$12 sps:$4 sm:$0xff]  }
  0xd0   : > { %1860 = vmatpush3.bf16.msra.mxu1 %v2080_v19  ;;  %v2093_v19 = vld [vmem:[%s3024_s7 + $0x60] ss:$12 sps:$4 sm:$0xff]  }
  0xd1   : > { %1865 = vmatprep.subr.bf16.mxu1 %v2323_v3 }
  0xfc   : > { %v2831_v0 = vpop.permute.xlu0 %972 }
  0xfd   : > { %vm974_vm2 = vcmp.eq.s32.totalorder %v2831_v0, 1 }
 0x166   : > { %v717_v21 = vpop.f32.mrb[0].mxu1 }
 0x167   : > { %v1823_v22 = vpop.f32.mrb[1].mxu1  ;;  %v718_v59 = vadd.f32 %v717_v21, %v510_v55  ;;  %v2098_v21 = vld [vmem:[%s3024_s7 + $0x7c] ss:$12 sps:$4 sm:$0xff]  }
 0x168   : > { %v720_v23 = vpop.f32.mrb[2].mxu1  ;;  %v2096_v22 = vld [vmem:[%s3024_s7 + $0x78] ss:$12 sps:$4 sm:$0xff]  }
 0x169   : > { %v1824_v24 = vpop.f32.mrb[3].mxu1  ;;  %v2110_v23 = vld [vmem:[%s3024_s7 + $0x80] ss:$12 sps:$4 sm:$0xff]  }
 0x16a   : > { %v2101_v24 = vld [vmem:[%s3024_s7 + $0x94] ss:$12 sps:$4 sm:$0xff]  }
 0x184   : > { %v902_v36 = vpop.f32.mrb[0].mxu0 }
 0x185   : > { %v1886_v38 = vadd.f32 %v1885_v35, %v902_v36  ;;  %v904_v39 = vpop.f32.mrb[1].mxu0 }
 0x186   : > { %v906_v40 = vpop.f32.mrb[2].mxu0  ;;  %v1888_v43 = vadd.f32 %v1887_v37, %v904_v39  ;;  %v943_v45 = vpop.f32.mrb[4].mxu1  ;;  %v1041_v39 = vld [vmem:[#allocation7] sm:$0x7] }
 0x187   : > { %v1711_v41 = vmul.f32 -1.442695, %v1886_v38  ;;  %v907_v42 = vpop.f32.mrb[3].mxu0  ;;  %v1843_v46 = vpop.f32.mrb[5].mxu1  ;;  %v944_v57 = vadd.f32 %v943_v45, %v736_v52  ;;  %v1042_v38 = vld [vmem:[%s3026_s9] sm:$0x7]  ;;  %v1050_v40 = vrot.slane %v1041_v39, %v2819_v27 }
 0x188   : > { %v1712_v44 = vmul.f32 -1.442695, %v1888_v43  ;;  %v946_v47 = vpop.f32.mrb[6].mxu1  ;;  %v1280_v42 = vrot.slane %v1042_v38, %v2821_v30 }
 0x189   : > { %2113 = vpow2.f32 %v1711_v41  ;;  %v1844_v48 = vpop.f32.mrb[7].mxu1  ;;  %v1054_v41 = vrot.slane %v1041_v39, %v2821_v30  ;;  %v1284_v30 = vrot.slane %v1042_v38, %v2827_v51 }
 0x18a   : > { %2115 = vpow2.f32 %v1712_v44 }
 0x18b   : > { %v1891_v45 = vadd.f32 %v1280_v42, %v1054_v41 }
 0x193   : > { %v2114_v49 = vpop.eup %2113 }
 0x194   : > { %v953_v50 = vadd.f32 1.0, %v2114_v49  ;;  %v2116_v54 = vpop.eup %2115 }
 0x195   : > { %v960_v56 = vadd.f32 1.0, %v2116_v54 }
 0x196   : > { %2117 = vrcp.f32 %v953_v50 }
 0x197   : > { %2119 = vrcp.f32 %v960_v56 }
 0x1a0   : > { %v2118_v58 = vpop.eup %2117 }
 0x1a1   : > { %v963_v60 = vmul.f32 %v2118_v58, %v944_v57  ;;  %v2120_v62 = vpop.eup %2119 }
 0x1a2   : > { %v966_v63 = vsub.f32 1.0, %v2120_v62  ;;  %v968_v5 = vmul.f32 %v2120_v62, %v2716_v53 }
 0x1a3   : > { %v964_v61 = vadd.f32 %v963_v60, %v718_v59 }
 0x1a5   : > { %2121 = vtanh.f32 %v964_v61  ;;  %v1058_v61 = vrot.slane %v1041_v39, %v2827_v51 }
 0x1af   : > { %v2122_v1 = vpop.eup %2121 }
 0x1b0   : > { %v967_v2 = vmul.f32 %v2122_v1, %v966_v63 }
 0x1b2   : > { %v969_v6 = vadd.f32 %v968_v5, %v967_v2 }
 0x1b4   : > { %v975_v7 = vsel %vm974_vm2, %v969_v6, %v2716_v53  ;;  %v2084_v53 = vld [vmem:[%s3024_s7 + $0x18] ss:$12 sps:$4 sm:$0xff]  }
 0x1b5   : > { %976 = vst [vmem:[#allocation9] sm:$0xff] %v975_v7  ;;  %v1045_v10 = vpack.c.bf16 %v975_v7, %v975_v7 }
 0x1b7   : > { %1223 = vmatmul.mubr.bf16.vlgmr.msra.gmra.mrb[4].mxu0 %v1045_v10  ;;  %1862 = vmatmul.mubr.bf16.vlgmr.msra.gmra.mrb[8].mxu1 %v1045_v10 }
 0x1b8   : > { %1417 = vmatpush1.bf16.msra.mxu0 %v2081_v8  ;;  %1866 = vmatpush3.bf16.msra.mxu1 %v2102_v9 }
 0x1b9   : > { %1418 = vmatprep.subr.bf16.mxu0 %v2086_v11  ;;  %1867 = vmatprep.subr.bf16.mxu1 %v2323_v3 }
 0x1ba   : > { %1448 = vmatprep.mubr.bf16.mxu0 %v2324_v4  ;;  %1881 = vmatprep.mubr.msk.bf16.mxu1 %vm2325_vm0, %v2323_v3  ;;  %v2090_v4 = vld [vmem:[%s3024_s7 + $0x48] ss:$12 sps:$4 sm:$0xff]  }
 0x1bc   : > { %1419 = vmatpush1.bf16.msra.mxu0 %v2084_v53  ;;  %1868 = vmatpush3.bf16.msra.mxu1 %v2106_v12 }
 0x1bd   : > { %1420 = vmatprep.subr.bf16.mxu0 %v2089_v13  ;;  %1869 = vmatprep.subr.bf16.mxu1 %v2323_v3 }
 0x1c0   : > { %1421 = vmatpush1.bf16.msra.mxu0 %v2087_v14  ;;  %1870 = vmatpush3.bf16.msra.mxu1 %v2107_v15 }
 0x1c1   : > { %1422 = vmatprep.subr.bf16.mxu0 %v2092_v16  ;;  %1871 = vmatprep.subr.bf16.mxu1 %v2323_v3 }
 0x1c4   : > { %1423 = vmatpush1.bf16.msra.mxu0 %v2090_v4  ;;  %1872 = vmatpush3.bf16.msra.mxu1 %v2108_v17 }
 0x1c5   : > { %1424 = vmatprep.subr.bf16.mxu0 %v2095_v18  ;;  %1873 = vmatprep.subr.bf16.mxu1 %v2323_v3 }
 0x1c8   : > { %1425 = vmatpush1.bf16.msra.mxu0 %v2093_v19  ;;  %1874 = vmatpush3.bf16.msra.mxu1 %v2109_v20 }
 0x1c9   : > { %1426 = vmatprep.subr.bf16.mxu0 %v2098_v21  ;;  %1875 = vmatprep.subr.bf16.mxu1 %v2323_v3 }
 0x1cc   : > { %1427 = vmatpush1.bf16.msra.mxu0 %v2096_v22  ;;  %1876 = vmatpush3.bf16.msra.mxu1 %v2110_v23 }
 0x1cd   : > { %1428 = vmatprep.subr.bf16.mxu0 %v2101_v24  ;;  %1877 = vmatprep.subr.bf16.mxu1 %v2323_v3 }
 0x1d0   : > { %1429 = vmatpush1.bf16.msra.mxu0 %v2099_v25  ;;  %1878 = vmatpush3.bf16.msra.mxu1 %v2111_v26 }
 0x1d1   : > { %1430 = vmatprep.subr.bf16.mxu0 %v2105_v28  ;;  %1879 = vmatprep.subr.bf16.mxu1 %v2323_v3  ;;  %v1276_v3 = vrot.slane %v1042_v38, %v2819_v27 }
 0x1d3   : > { %v1889_v43 = vadd.f32 %v1276_v3, %v1050_v40 }
 0x1d4   : > { %1431 = vmatpush1.bf16.msra.mxu0 %v2103_v29  ;;  %1880 = vmatpush3.bf16.msra.mxu1 %v2112_v32 }
 0x1d7   : > { %1449 = vmatmul.mubr.bf16.vlgmr.msra.gmra.mrb[4].mxu0 %v1271_v33  ;;  %1882 = vmatmul.mubr.bf16.vlgmr.msra.gmra.mrb[12].mxu1 %v1271_v33 }
 0x28a   : > { %v1265_v34 = vpop.f32.mrb[8].mxu1 }
 0x28b   : > { %v1863_v35 = vpop.f32.mrb[9].mxu1  ;;  %v1266_v2 = vadd.f32 %v1265_v34, %v1058_v61 }
 0x28c   : > { %v1268_v36 = vpop.f32.mrb[10].mxu1 }
 0x28d   : > { %v1864_v37 = vpop.f32.mrb[11].mxu1 }
 0x2aa   : > { %v1450_v44 = vpop.f32.mrb[4].mxu0  ;;  %v1491_v46 = vpop.f32.mrb[12].mxu1 }
 0x2ab   : > { %v1890_v47 = vadd.f32 %v1889_v43, %v1450_v44  ;;  %v1452_v48 = vpop.f32.mrb[5].mxu0  ;;  %v1883_v49 = vpop.f32.mrb[13].mxu1  ;;  %v1492_v63 = vadd.f32 %v1491_v46, %v1284_v30 }
 0x2ac   : > { %v1454_v50 = vpop.f32.mrb[6].mxu0  ;;  %v1494_v52 = vpop.f32.mrb[14].mxu1  ;;  %v1892_v57 = vadd.f32 %v1891_v45, %v1452_v48 }
 0x2ad   : > { %v1761_v54 = vmul.f32 -1.442695, %v1890_v47  ;;  %v1455_v55 = vpop.f32.mrb[7].mxu0  ;;  %v1884_v56 = vpop.f32.mrb[15].mxu1 }
 0x2ae   : > { %v1762_v58 = vmul.f32 -1.442695, %v1892_v57 }
 0x2af   : > { %2123 = vpow2.f32 %v1761_v54 }
 0x2b0   : > { %2125 = vpow2.f32 %v1762_v58 }
 0x2b9   : > { %v2124_v27 = vpop.eup %2123 }
 0x2ba   : > { %v1501_v59 = vadd.f32 1.0, %v2124_v27  ;;  %v2126_v60 = vpop.eup %2125 }
 0x2bb   : > { %v1508_v62 = vadd.f32 1.0, %v2126_v60 }
 0x2bc   : > { %2127 = vrcp.f32 %v1501_v59 }
 0x2bd   : > { %2129 = vrcp.f32 %v1508_v62 }
 0x2c6   : > { %v2128_v1 = vpop.eup %2127 }
 0x2c7   : > { %v1511_v5 = vmul.f32 %v2128_v1, %v1492_v63  ;;  %v2130_v7 = vpop.eup %2129 }
 0x2c8   : > { %v1514_v8 = vsub.f32 1.0, %v2130_v7  ;;  %v1516_v11 = vmul.f32 %v2130_v7, %v2913_v31 }
 0x2c9   : > { %v1512_v6 = vadd.f32 %v1511_v5, %v1266_v2 }
 0x2cb   : > { %2131 = vtanh.f32 %v1512_v6 }
 0x2d5   : > { %v2132_v9 = vpop.eup %2131 }
 0x2d6   : > { %v1515_v10 = vmul.f32 %v2132_v9, %v1514_v8 }
 0x2d8   : > { %v1517_v51 = vadd.f32 %v1516_v11, %v1515_v10 }
 0x2da   : > { %v1520_v53 = vsel %vm974_vm2, %v1517_v51, 0.0  ;;  %v1518_v12 = vsel %vm974_vm2, %v1517_v51, %v2913_v31 }
 0x2db   : > { %1521 = vst [vmem:[%s412_s16] sm:$0xff] %v1520_v53  ;;  %1519 = vst [vmem:[#allocation9 + $0x8] sm:$0xff] %v1518_v12 }
 0x2dc   : > { %2230 = shalt.err (!%p2227_p2)
}
 0x2dd   : > { %s2231_s15 = scalar_lea.hbm %s2937_s12, 128  ;;  %s2235_s22 = scalar_lea.hbm %s3027_s10, 1024 }
 0x2de   : > { %p2232_p1 = scmp.ne.s32.totalorder %s2937_s12, %s2231_s15  ;;  %p2236_p5 = scmp.lt.u32.totalorder %s2937_s12, %s3027_s10 }
 0x2df   : > { %p2237_p13 = scmp.lt.u32.totalorder %s2235_s22, %s2231_s15  ;;  %p2239_p10 = scmp.lt.u32.totalorder %s2231_s15, %s2937_s12 }
 0x2e0   : > { %p2233_p0 = pnand %p2232_p1, %p3054_p11 }
 0x2e1   : > { %p2238_p9 = por %p2237_p13, %p2236_p5 }
 0x2e2   : > { %p2234_p6 = pneg %p2233_p0 }
 0x2e3   : > { %p2240_p3 = por %p2239_p10, %p2238_p9 }
 0x2e5   : > { %p2241_p4 = pnand %p2240_p3, %p2234_p6 }
 0x2e7   : > { %2244 = shalt.err (!%p2241_p4)
}
 0x2e8   : > { %1913 = dma.vmem_to_hbm [thread:$0]  (%p3054_p11), %s2939_s13, 128, %s2937_s12, %s1523_s14  }
 0x2e9   : > { %s2245_s19 = scalar_lea.vmem %s2941_s23, 256  ;;  %p3055_p8 = scmp.eq.s32.totalorder %s2411_s21, 7 }
 0x2ea   : > { %p2246_p7 = scmp.ne.s32.totalorder %s2941_s23, %s2245_s19  ;;  %p2252_p1 = scmp.lt.s32.totalorder %s2941_s23, %s2941_s23 }
 0x2eb   : > { %p2253_p0 = scmp.lt.s32.totalorder %s2245_s19, %s2245_s19 }
 0x2ec   : > { %p2247_p12 = pnand %p2246_p7, %p3055_p8 }
 0x2ed   : > { %p2254_p5 = por %p2253_p0, %p2252_p1 }
 0x2ee   : > { %p2248_p2 = pneg %p2247_p12 }
 0x2f0   : > { %p2255_p6 = pnand %p2254_p5, %p2248_p2 }
 0x2f2   : > { %2258 = shalt.err (!%p2255_p6)
}
 0x2f3   : > { %s2259_s17 = scalar_lea.hbm %s3028_s11, 256  ;;  %p3056_p13 = pmov %p3055_p8 }
 0x2f4   : > { %p2260_p11 = scmp.ne.s32.totalorder %s3028_s11, %s2259_s17  ;;  %p2265_p3 = scmp.lt.u32.totalorder %s2259_s17, %s3028_s11 }
 0x2f6   : > { %p2261_p9 = pnand %p2260_p11, %p3056_p13 }
 0x2f8   : > { %p2262_p10 = pneg %p2261_p9 }
 0x2fa   : > { %p2267_p4 = pnand %p2265_p3, %p2262_p10 }
 0x2fc   : > { %2270 = shalt.err (!%p2267_p4)
}
 0x2fd   : > { %s2328_s14 = smov 128   ;;  %s2329_s15 = smov 8  }
 0x2fe   : > { %p3057_p7 = pmov %p3055_p8 }
 0x300   : > { %1915 = dma.vmem_to_hbm [thread:$0]  (%p3057_p7), %s2941_s23, 256, %s3028_s11, [#allocation10], %s2328_s14, %s2328_s14, %s2329_s15  }
 0x301   : > { %p3058_p8 = pmov %p3057_p7 }
 0x302   : > { %p3059_p12 = pmov %p3057_p7 }
 0x303   : > { %2296 = dma.done.wait (%p3058_p8), [#allocation10], 256  }
 0x304   : > { %2298 = vsyncadd (%p3059_p12), [#allocation10], 4294967040 }
 0x305 PF: > { %s3060_s22 = sld [smem:[#allocation15_spill]]  ;;  %s3061_s25 = sld [smem:[#allocation19_spill]] }
 0x306   : > { %p1941_p2 = scmp.ge.s32.totalorder %s2317_s20, 2 }
 0x30b   : > { %s1565_s24 = sand.u32 1, %s3060_s22   ;;  %p3062_p1 = scmp.ne.s32.totalorder %s3061_s25, 0 }
 0x30c   : > { %s1566_s19 = scalar_lea.sflag [#allocation4], %s1565_s24 }
 0x30d   : > { %p1930_p0 = pnand %p1941_p2, %p3062_p1 }
 0x30f   : > { %2300 = dma.done.wait (!%p1930_p0), %s1566_s19, 128  }
 0x310   : > { %2302 = vsyncadd (!%p1930_p0), %s1566_s19, 4294967168  ;;  %s3063_s20 = sld [smem:[#allocation17_spill]]  ;;  %s3064_s30 = sld [smem:[#allocation16_spill]] }
 0x311   : > { %s3065_s19 = sld [smem:[#allocation18_spill]]  ;;  %s3066_s17 = smov %s2309_s18 }
 0x316   : > { %p25_p5 = scmp.ge.s32.totalorder %s3063_s20, 10   ;;  %s3067_s18 = smov %s3064_s30 }
 0x318   :  { %27 = sbr.rel (!%p25_p5) target bundleno = 6 (0x6), region = 121 }
 0x31f   :  { %1571 = vsyncpa [#allocation3], 1 }
 0x320   :  { %1573 = vsyncpa [#allocation3 + $0x1], 1 }
 0x321   :  { %1574 = vsyncpa [#allocation6], 1 }
 0x322   :  { %1575 = vsyncpa [#allocation4], 1 }
 0x323   :  { %1577 = vsyncpa [#allocation4 + $0x1], 1 }
 0x324   :  { %1578 = vsyncpa [#allocation10], 1 }

</bundles_post_ra>
